<compile_context>
chip_gen: v5e
topology: v5e:2x2
jax: 0.10.0
libtpu: 0.0.40
codegen_flags: <defaults>
</compile_context>

<pallas_src>
import functools
import math

import jax
import jax.numpy as jnp
import numpy as np
from jax.experimental import pallas as pl
from jax.experimental.pallas import tpu as pltpu  # noqa: F401  (TPU backend)

HIDDEN_DIM = 12
HEAD_NUM = 3
HEAD_DIM = HIDDEN_DIM // HEAD_NUM  # 4
OUT_DIM = HEAD_DIM                 # out_proj: hidden -> head_dim
MAX_SEQ_LEN = 4


def _mha_kernel(xr_ref, wqkv_ref, bqkv_ref, wos_ref, bo_ref, hot_ref, mask_ref,
                o_ref, *, batch, seq):
    # Fused QKV projection on the (batch, head, seq)-replicated input:
    # (B*H*S, hd) @ (hd, 3*hidden) -> (B*H*S, 3*hidden).  One MXU op.
    qkv = jnp.dot(xr_ref[...], wqkv_ref[...],
                  preferred_element_type=jnp.float32) + bqkv_ref[...]

    hot = hot_ref[...]  # (B*H*S, HEAD_NUM) one-hot of each row's head id (f32)

    def head_select(mat, base, width):
        # Per-row gather of that row's head slice along lanes, expressed as a
        # one-hot weighted sum of static lane slices (VPU only, no relayouts).
        acc = hot[:, 0:1] * mat[:, base:base + width]
        for h in range(1, HEAD_NUM):
            lo = base + h * width
            acc = acc + hot[:, h:h + 1] * mat[:, lo:lo + width]
        return acc

    # 1/sqrt(head_dim) is already folded into Wq / bq in the wrapper.
    q = head_select(qkv, 0 * HIDDEN_DIM, HEAD_DIM)   # (B*H*S, hd)
    k = head_select(qkv, 1 * HIDDEN_DIM, HEAD_DIM)
    v = head_select(qkv, 2 * HIDDEN_DIM, HEAD_DIM)

    # One block-diagonal (batch x head) causal attention instead of B*H tiny ones.
    s = jnp.einsum('md,nd->mn', q, k,
                   preferred_element_type=jnp.float32) + mask_ref[...]

    # Numerically-stable softmax; reciprocal on the EUP slot.
    m = jnp.max(s, axis=-1, keepdims=True)
    e = jnp.exp(s - m)
    denom = jnp.sum(e, axis=-1, keepdims=True)
    p = e * pl.reciprocal(denom, approx=True)
    # TODO(synk): att_dropout(0.1) omitted — identity in eval mode.

    att = jnp.dot(p, v, preferred_element_type=jnp.float32)          # (B*H*S, hd)

    # Output projection: per-head Wo slices pre-stacked along lanes in the wrapper,
    # then per-row head select and a cross-head sublane reduction (no concatenate).
    z = jnp.dot(att, wos_ref[...], preferred_element_type=jnp.float32)  # (B*H*S, H*out)
    partial = head_select(z, 0, OUT_DIM)                                # (B*H*S, out)

    for b in range(batch):                      # tiny static unroll
        base = b * HEAD_NUM * seq
        acc = partial[base:base + seq, :]
        for h in range(1, HEAD_NUM):
            lo = base + h * seq
            acc = acc + partial[lo:lo + seq, :]
        o_ref[b * seq:(b + 1) * seq, :] = acc + bo_ref[...]


def multi_head_attention(x, params):
    """x: (B, S, head_dim) float32. Returns (B, S, head_dim)."""
    B, S, _ = x.shape
    wq, bq, wk, bk, wv, bv, wo, bo = params
    R = B * HEAD_NUM * S

    # ---- wrapper-side (XLA / numpy) preprocessing: all one-time, outside the kernel ----
    scale = 1.0 / math.sqrt(HEAD_DIM)
    wqkv = jnp.concatenate([wq * scale, wk, wv], axis=1)      # (hd, 3*hidden), scale folded
    bqkv = jnp.concatenate([bq * scale, bk, bv], axis=1)      # (1, 3*hidden)
    # Stack per-head output-projection slices along lanes: (hd, HEAD_NUM*out).
    wo_stack = jnp.concatenate(
        [wo[h * HEAD_DIM:(h + 1) * HEAD_DIM, :] for h in range(HEAD_NUM)], axis=1)

    # Row layout (b, h, s): replicate x once per head so a single matmul produces
    # per-head rows directly (redundant flops are negligible at this size).
    x_rep = jnp.broadcast_to(
        x.reshape(B, 1, S, HEAD_DIM), (B, HEAD_NUM, S, HEAD_DIM)).reshape(R, HEAD_DIM)

    # Trace-time constants: per-row head one-hot + block-diagonal causal mask.
    idx = np.arange(R)
    blk = idx // S                     # (b*HEAD_NUM + h)
    pos = idx % S                      # s
    head_id = blk % HEAD_NUM
    onehot = (head_id[:, None] == np.arange(HEAD_NUM)[None, :]).astype(np.float32)
    valid = (blk[:, None] == blk[None, :]) & (pos[None, :] <= pos[:, None])
    neg_mask = np.where(valid, 0.0, -1e30).astype(np.float32)  # finite, no -inf NaN hazard

    full2 = lambda r, c: pl.BlockSpec((r, c), lambda: (0, 0))

    out2d = pl.pallas_call(
        functools.partial(_mha_kernel, batch=B, seq=S),
        out_shape=jax.ShapeDtypeStruct((B * S, OUT_DIM), jnp.float32),
        in_specs=[
            full2(R, HEAD_DIM),                    # x replicated per head
            full2(HEAD_DIM, 3 * HIDDEN_DIM),       # packed (scaled) Wqkv
            full2(1, 3 * HIDDEN_DIM),              # packed (scaled) bqkv
            full2(HEAD_DIM, HEAD_NUM * OUT_DIM),   # stacked Wo
            full2(1, OUT_DIM),                     # bo
            full2(R, HEAD_NUM),                    # head one-hot
            full2(R, R),                           # block-diagonal causal mask
        ],
        out_specs=full2(B * S, OUT_DIM),
    )(x_rep, wqkv, bqkv, wo_stack, bo, jnp.asarray(onehot), jnp.asarray(neg_mask))

    return out2d.reshape(B, S, OUT_DIM)


def init_params(key):
    """Deterministic init, PyTorch-Linear-like uniform(-1/sqrt(fan_in), 1/sqrt(fan_in))."""
    ks = jax.random.split(key, 8)

    def lin(kw, kb, fan_in, fan_out):
        bound = 1.0 / math.sqrt(fan_in)
        w = jax.random.uniform(kw, (fan_in, fan_out), jnp.float32, -bound, bound)
        b = jax.random.uniform(kb, (1, fan_out), jnp.float32, -bound, bound)
        return w, b

    wq, bq = lin(ks[0], ks[1], HEAD_DIM, HIDDEN_DIM)
    wk, bk = lin(ks[2], ks[3], HEAD_DIM, HIDDEN_DIM)
    wv, bv = lin(ks[4], ks[5], HEAD_DIM, HIDDEN_DIM)
    wo, bo = lin(ks[6], ks[7], HIDDEN_DIM, OUT_DIM)
    return (wq, bq, wk, bk, wv, bv, wo, bo)


def reference(x, params):
    """Pure-JAX reference mirroring the PyTorch forward (eval mode, no kv-cache)."""
    # TODO(synk): kv-cache branch (use_kvcache) of the PyTorch module is not implemented
    # (it is disabled by default: use_kvcache is None).
    wq, bq, wk, bk, wv, bv, wo, bo = params
    B, S, _ = x.shape
    q = x @ wq + bq
    k = x @ wk + bk
    v = x @ wv + bv
    q = q.reshape(B, S, HEAD_NUM, HEAD_DIM).transpose(0, 2, 1, 3)
    k = k.reshape(B, S, HEAD_NUM, HEAD_DIM).transpose(0, 2, 1, 3)
    v = v.reshape(B, S, HEAD_NUM, HEAD_DIM).transpose(0, 2, 1, 3)
    mask = jnp.triu(jnp.full((MAX_SEQ_LEN, MAX_SEQ_LEN), -jnp.inf, jnp.float32), k=1)[:S, :S]
    s = jnp.einsum('bhqd,bhkd->bhqk', q, k) / math.sqrt(HEAD_DIM) + mask
    p = jax.nn.softmax(s, axis=-1)
    o = jnp.einsum('bhqk,bhkd->bhqd', p, v)
    o = o.transpose(0, 2, 1, 3).reshape(B, S, HIDDEN_DIM)
    return o @ wo + bo


if __name__ == "__main__":
    key = jax.random.PRNGKey(0)
    k_x, k_p = jax.random.split(key)

    # matches the PyTorch example input: x = torch.randn(2, 3, 4)
    x = jax.random.normal(k_x, (2, 3, HEAD_DIM), jnp.float32)
    params = init_params(k_p)

    out = multi_head_attention(x, params)
    out = jax.block_until_ready(out)

    ref = reference(x, params)
    # slightly relaxed tolerance: softmax uses the EUP approximate reciprocal
    np.testing.assert_allclose(np.asarray(out), np.asarray(ref), rtol=2e-3, atol=2e-3)

    print("KERNEL_OK")
</pallas_src>

<mosaic_0001>
module attributes {stable_mosaic.version = 11 : i64} {
  func.func @_mha_kernel(%arg0: memref<18x4xf32, #tpu.memory_space<vmem>>, %arg1: memref<4x36xf32, #tpu.memory_space<vmem>>, %arg2: memref<1x36xf32, #tpu.memory_space<vmem>>, %arg3: memref<4x12xf32, #tpu.memory_space<vmem>>, %arg4: memref<1x4xf32, #tpu.memory_space<vmem>>, %arg5: memref<18x3xf32, #tpu.memory_space<vmem>>, %arg6: memref<18x18xf32, #tpu.memory_space<vmem>>, %arg7: memref<6x4xf32, #tpu.memory_space<vmem>>) attributes {dimension_semantics = [], scalar_prefetch = 0 : i64, scratch_operands = 0 : i64, tpu.core_type = #tpu.core_type<tc>} {
    %c0 = arith.constant 0 : index
    %c0_0 = arith.constant 0 : index
    %0 = vector.load %arg0[%c0, %c0_0] : memref<18x4xf32, #tpu.memory_space<vmem>>, vector<18x4xf32>
    %c0_1 = arith.constant 0 : index
    %c0_2 = arith.constant 0 : index
    %1 = vector.load %arg1[%c0_1, %c0_2] : memref<4x36xf32, #tpu.memory_space<vmem>>, vector<4x36xf32>
    %cst = arith.constant dense<0.000000e+00> : vector<18x36xf32>
    %2 = tpu.matmul %0, %1, %cst {dimension_numbers = #tpu.dot_dimension_numbers<[1], [0], [0], [1], [0, 0, 1, 1], [], []>} : vector<18x4xf32>, vector<4x36xf32>, vector<18x36xf32> -> vector<18x36xf32>
    %c0_3 = arith.constant 0 : index
    %c0_4 = arith.constant 0 : index
    %3 = vector.load %arg2[%c0_3, %c0_4] : memref<1x36xf32, #tpu.memory_space<vmem>>, vector<1x36xf32>
    %4 = vector.broadcast %3 : vector<1x36xf32> to vector<18x36xf32>
    %5 = arith.addf %2, %4 : vector<18x36xf32>
    %c0_5 = arith.constant 0 : index
    %c0_6 = arith.constant 0 : index
    %6 = vector.load %arg5[%c0_5, %c0_6] : memref<18x3xf32, #tpu.memory_space<vmem>>, vector<18x3xf32>
    %7 = vector.extract_strided_slice %6 {offsets = [0, 0], sizes = [18, 1], strides = [1, 1]} : vector<18x3xf32> to vector<18x1xf32>
    %8 = vector.extract_strided_slice %5 {offsets = [0, 0], sizes = [18, 4], strides = [1, 1]} : vector<18x36xf32> to vector<18x4xf32>
    %9 = vector.broadcast %7 : vector<18x1xf32> to vector<18x4xf32>
    %10 = arith.mulf %9, %8 : vector<18x4xf32>
    %11 = vector.extract_strided_slice %6 {offsets = [0, 1], sizes = [18, 1], strides = [1, 1]} : vector<18x3xf32> to vector<18x1xf32>
    %12 = vector.extract_strided_slice %5 {offsets = [0, 4], sizes = [18, 4], strides = [1, 1]} : vector<18x36xf32> to vector<18x4xf32>
    %13 = vector.broadcast %11 : vector<18x1xf32> to vector<18x4xf32>
    %14 = arith.mulf %13, %12 : vector<18x4xf32>
    %15 = arith.addf %10, %14 : vector<18x4xf32>
    %16 = vector.extract_strided_slice %6 {offsets = [0, 2], sizes = [18, 1], strides = [1, 1]} : vector<18x3xf32> to vector<18x1xf32>
    %17 = vector.extract_strided_slice %5 {offsets = [0, 8], sizes = [18, 4], strides = [1, 1]} : vector<18x36xf32> to vector<18x4xf32>
    %18 = vector.broadcast %16 : vector<18x1xf32> to vector<18x4xf32>
    %19 = arith.mulf %18, %17 : vector<18x4xf32>
    %20 = arith.addf %15, %19 : vector<18x4xf32>
    %21 = vector.extract_strided_slice %6 {offsets = [0, 0], sizes = [18, 1], strides = [1, 1]} : vector<18x3xf32> to vector<18x1xf32>
    %22 = vector.extract_strided_slice %5 {offsets = [0, 12], sizes = [18, 4], strides = [1, 1]} : vector<18x36xf32> to vector<18x4xf32>
    %23 = vector.broadcast %21 : vector<18x1xf32> to vector<18x4xf32>
    %24 = arith.mulf %23, %22 : vector<18x4xf32>
    %25 = vector.extract_strided_slice %6 {offsets = [0, 1], sizes = [18, 1], strides = [1, 1]} : vector<18x3xf32> to vector<18x1xf32>
    %26 = vector.extract_strided_slice %5 {offsets = [0, 16], sizes = [18, 4], strides = [1, 1]} : vector<18x36xf32> to vector<18x4xf32>
    %27 = vector.broadcast %25 : vector<18x1xf32> to vector<18x4xf32>
    %28 = arith.mulf %27, %26 : vector<18x4xf32>
    %29 = arith.addf %24, %28 : vector<18x4xf32>
    %30 = vector.extract_strided_slice %6 {offsets = [0, 2], sizes = [18, 1], strides = [1, 1]} : vector<18x3xf32> to vector<18x1xf32>
    %31 = vector.extract_strided_slice %5 {offsets = [0, 20], sizes = [18, 4], strides = [1, 1]} : vector<18x36xf32> to vector<18x4xf32>
    %32 = vector.broadcast %30 : vector<18x1xf32> to vector<18x4xf32>
    %33 = arith.mulf %32, %31 : vector<18x4xf32>
    %34 = arith.addf %29, %33 : vector<18x4xf32>
    %35 = vector.extract_strided_slice %6 {offsets = [0, 0], sizes = [18, 1], strides = [1, 1]} : vector<18x3xf32> to vector<18x1xf32>
    %36 = vector.extract_strided_slice %5 {offsets = [0, 24], sizes = [18, 4], strides = [1, 1]} : vector<18x36xf32> to vector<18x4xf32>
    %37 = vector.broadcast %35 : vector<18x1xf32> to vector<18x4xf32>
    %38 = arith.mulf %37, %36 : vector<18x4xf32>
    %39 = vector.extract_strided_slice %6 {offsets = [0, 1], sizes = [18, 1], strides = [1, 1]} : vector<18x3xf32> to vector<18x1xf32>
    %40 = vector.extract_strided_slice %5 {offsets = [0, 28], sizes = [18, 4], strides = [1, 1]} : vector<18x36xf32> to vector<18x4xf32>
    %41 = vector.broadcast %39 : vector<18x1xf32> to vector<18x4xf32>
    %42 = arith.mulf %41, %40 : vector<18x4xf32>
    %43 = arith.addf %38, %42 : vector<18x4xf32>
    %44 = vector.extract_strided_slice %6 {offsets = [0, 2], sizes = [18, 1], strides = [1, 1]} : vector<18x3xf32> to vector<18x1xf32>
    %45 = vector.extract_strided_slice %5 {offsets = [0, 32], sizes = [18, 4], strides = [1, 1]} : vector<18x36xf32> to vector<18x4xf32>
    %46 = vector.broadcast %44 : vector<18x1xf32> to vector<18x4xf32>
    %47 = arith.mulf %46, %45 : vector<18x4xf32>
    %48 = arith.addf %43, %47 : vector<18x4xf32>
    "tpu.trace_start"() <{level = 10 : i32, message = "md,nd->mn"}> : () -> ()
    %cst_7 = arith.constant dense<0.000000e+00> : vector<18x18xf32>
    %49 = tpu.matmul %20, %34, %cst_7 {dimension_numbers = #tpu.dot_dimension_numbers<[1], [1], [0], [0], [0, 0, 1, 0], [], []>} : vector<18x4xf32>, vector<18x4xf32>, vector<18x18xf32> -> vector<18x18xf32>
    "tpu.trace_stop"() : () -> ()
    %c0_8 = arith.constant 0 : index
    %c0_9 = arith.constant 0 : index
    %50 = vector.load %arg6[%c0_8, %c0_9] : memref<18x18xf32, #tpu.memory_space<vmem>>, vector<18x18xf32>
    %51 = arith.addf %49, %50 : vector<18x18xf32>
    %cst_10 = arith.constant dense<0xFF800000> : vector<18xf32>
    %52 = vector.multi_reduction <maximumf>, %51, %cst_10 [1] : vector<18x18xf32> to vector<18xf32>
    %53 = vector.shape_cast %52 : vector<18xf32> to vector<18x1xf32>
    %54 = vector.broadcast %53 : vector<18x1xf32> to vector<18x18xf32>
    %55 = arith.subf %51, %54 : vector<18x18xf32>
    %56 = math.exp %55 : vector<18x18xf32>
    %cst_11 = arith.constant dense<0.000000e+00> : vector<18xf32>
    %57 = vector.multi_reduction <add>, %56, %cst_11 [1] : vector<18x18xf32> to vector<18xf32>
    %58 = vector.shape_cast %57 : vector<18xf32> to vector<18x1xf32>
    %59 = tpu.reciprocal %58 {approx = true} : vector<18x1xf32> -> vector<18x1xf32>
    %60 = vector.broadcast %59 : vector<18x1xf32> to vector<18x18xf32>
    %61 = arith.mulf %56, %60 : vector<18x18xf32>
    %cst_12 = arith.constant dense<0.000000e+00> : vector<18x4xf32>
    %62 = tpu.matmul %61, %48, %cst_12 {dimension_numbers = #tpu.dot_dimension_numbers<[1], [0], [0], [1], [0, 0, 1, 1], [], []>} : vector<18x18xf32>, vector<18x4xf32>, vector<18x4xf32> -> vector<18x4xf32>
    %c0_13 = arith.constant 0 : index
    %c0_14 = arith.constant 0 : index
    %63 = vector.load %arg3[%c0_13, %c0_14] : memref<4x12xf32, #tpu.memory_space<vmem>>, vector<4x12xf32>
    %cst_15 = arith.constant dense<0.000000e+00> : vector<18x12xf32>
    %64 = tpu.matmul %62, %63, %cst_15 {dimension_numbers = #tpu.dot_dimension_numbers<[1], [0], [0], [1], [0, 0, 1, 1], [], []>} : vector<18x4xf32>, vector<4x12xf32>, vector<18x12xf32> -> vector<18x12xf32>
    %65 = vector.extract_strided_slice %6 {offsets = [0, 0], sizes = [18, 1], strides = [1, 1]} : vector<18x3xf32> to vector<18x1xf32>
    %66 = vector.extract_strided_slice %64 {offsets = [0, 0], sizes = [18, 4], strides = [1, 1]} : vector<18x12xf32> to vector<18x4xf32>
    %67 = vector.broadcast %65 : vector<18x1xf32> to vector<18x4xf32>
    %68 = arith.mulf %67, %66 : vector<18x4xf32>
    %69 = vector.extract_strided_slice %6 {offsets = [0, 1], sizes = [18, 1], strides = [1, 1]} : vector<18x3xf32> to vector<18x1xf32>
    %70 = vector.extract_strided_slice %64 {offsets = [0, 4], sizes = [18, 4], strides = [1, 1]} : vector<18x12xf32> to vector<18x4xf32>
    %71 = vector.broadcast %69 : vector<18x1xf32> to vector<18x4xf32>
    %72 = arith.mulf %71, %70 : vector<18x4xf32>
    %73 = arith.addf %68, %72 : vector<18x4xf32>
    %74 = vector.extract_strided_slice %6 {offsets = [0, 2], sizes = [18, 1], strides = [1, 1]} : vector<18x3xf32> to vector<18x1xf32>
    %75 = vector.extract_strided_slice %64 {offsets = [0, 8], sizes = [18, 4], strides = [1, 1]} : vector<18x12xf32> to vector<18x4xf32>
    %76 = vector.broadcast %74 : vector<18x1xf32> to vector<18x4xf32>
    %77 = arith.mulf %76, %75 : vector<18x4xf32>
    %78 = arith.addf %73, %77 : vector<18x4xf32>
    %79 = vector.extract_strided_slice %78 {offsets = [0, 0], sizes = [3, 4], strides = [1, 1]} : vector<18x4xf32> to vector<3x4xf32>
    %80 = vector.extract_strided_slice %78 {offsets = [3, 0], sizes = [3, 4], strides = [1, 1]} : vector<18x4xf32> to vector<3x4xf32>
    %81 = arith.addf %79, %80 : vector<3x4xf32>
    %82 = vector.extract_strided_slice %78 {offsets = [6, 0], sizes = [3, 4], strides = [1, 1]} : vector<18x4xf32> to vector<3x4xf32>
    %83 = arith.addf %81, %82 : vector<3x4xf32>
    %c0_16 = arith.constant 0 : index
    %c0_17 = arith.constant 0 : index
    %84 = vector.load %arg4[%c0_16, %c0_17] : memref<1x4xf32, #tpu.memory_space<vmem>>, vector<1x4xf32>
    %85 = vector.broadcast %84 : vector<1x4xf32> to vector<3x4xf32>
    %86 = arith.addf %83, %85 : vector<3x4xf32>
    %c0_18 = arith.constant 0 : index
    %c0_19 = arith.constant 0 : index
    %87 = vector.load %arg7[%c0_18, %c0_19] : memref<6x4xf32, #tpu.memory_space<vmem>>, vector<3x4xf32>
    tpu.vector_store %arg7[%c0_18, %c0_19], %86 {strides = array<i32>} : memref<6x4xf32, #tpu.memory_space<vmem>>, vector<3x4xf32>,
    %88 = vector.extract_strided_slice %78 {offsets = [9, 0], sizes = [3, 4], strides = [1, 1]} : vector<18x4xf32> to vector<3x4xf32>
    %89 = vector.extract_strided_slice %78 {offsets = [12, 0], sizes = [3, 4], strides = [1, 1]} : vector<18x4xf32> to vector<3x4xf32>
    %90 = arith.addf %88, %89 : vector<3x4xf32>
    %91 = vector.extract_strided_slice %78 {offsets = [15, 0], sizes = [3, 4], strides = [1, 1]} : vector<18x4xf32> to vector<3x4xf32>
    %92 = arith.addf %90, %91 : vector<3x4xf32>
    %c0_20 = arith.constant 0 : index
    %c0_21 = arith.constant 0 : index
    %93 = vector.load %arg4[%c0_20, %c0_21] : memref<1x4xf32, #tpu.memory_space<vmem>>, vector<1x4xf32>
    %94 = vector.broadcast %93 : vector<1x4xf32> to vector<3x4xf32>
    %95 = arith.addf %92, %94 : vector<3x4xf32>
    %c3 = arith.constant 3 : index
    %c0_22 = arith.constant 0 : index
    %96 = vector.load %arg7[%c3, %c0_22] : memref<6x4xf32, #tpu.memory_space<vmem>>, vector<3x4xf32>
    tpu.vector_store %arg7[%c3, %c0_22], %95 {strides = array<i32>} : memref<6x4xf32, #tpu.memory_space<vmem>>, vector<3x4xf32>,
    return
  }
}

</mosaic_0001>

<bundles_post_ra>
// kernel: tpu_custom_call.1
= control target key start
LH: loop header
LB: loop body
LE: loop exit
PB: predicated region body
PF: predicated region fallthrough
CT: control target
= control target key end

     0   :  { %vm44_vm0 = vcmask 1043456   ;;  %vm34_vm1 = vcmask 31744   ;;  %v454_v0 = vmov 1   ;;  %v455_v7 = vmov 2   ;;  %s459_s15 = smov 116   ;;  %s460_s22 = smov 104   ;;  %s623_s5 = inlined_call_operand.vmem [shape: f32[18,3], index: 5, kind: input, shape index: {}]   ;;  %s624_s1 = inlined_call_operand.vmem [shape: f32[4,36], index: 1, kind: input, shape index: {}]   ;;  %s625_s0 = inlined_call_operand.vmem [shape: f32[18,4], index: 0, kind: input, shape index: {}]   ;;  %s626_s2 = inlined_call_operand.vmem [shape: f32[1,36], index: 2, kind: input, shape index: {}]   ;;  %s627_s6 = inlined_call_operand.vmem [shape: f32[18,18], index: 6, kind: input, shape index: {}]   ;;  %s628_s3 = inlined_call_operand.vmem [shape: f32[4,12], index: 3, kind: input, shape index: {}]   ;;  %s629_s4 = inlined_call_operand.vmem [shape: f32[1,4], index: 4, kind: input, shape index: {}]   ;;  %s630_s7 = inlined_call_operand.vmem [shape: f32[6,4], index: 7, kind: output, shape index: {}]  }
   0x1   :  { %427 = vset.pattern.permute.xlu1 %v454_v0  ;;  %v75_v1 = vld [vmem:[%s623_s5 + $0x8] sm:$0xff]  ;;  %v29_v2 = vld [vmem:[%s624_s1] sm:$0xf]  ;;  %425 = vset.pattern.permute.xlu0 %v454_v0  ;;  %v76_v4 = vld [vmem:[%s623_s5 + $0x10] sm:$0x3]  ;;  %v456_v9 = vmov 0  }
   0x2   :  { %v26_v3 = vld [vmem:[%s625_s0] sm:$0xff]  ;;  %100 = vperm.xlu1 %427, %v75_v1   ;;  %400 = vmatpush.msk.msra.mxu0 %vm44_vm0, %v29_v2  ;;  %v27_v6 = vld [vmem:[%s625_s0 + $0x8] sm:$0xff]  ;;  %v28_v8 = vld [vmem:[%s625_s0 + $0x10] sm:$0x3]  ;;  %s457_s0 = smov 124   ;;  %vm205_vm2 = vcmask 146432  }
   0x3   :  { %401 = vmatmul.msk.f32.vlgmr.msra.gmra.mxu0 %vm34_vm1, %v26_v3  ;;  %104 = vperm.xlu0 %425, %v76_v4   ;;  %v74_v5 = vld [vmem:[%s623_s5] sm:$0xff]  ;;  %v156_v54 = vld [vmem:[%s627_s6 + $0x8] sm:$0xff]  ;;  %v157_v58 = vld [vmem:[%s627_s6 + $0x10] sm:$0x3]  ;;  %vm212_vm3 = vcmask 140288   ;;  %vm257_vm4 = vcmask 1041408  }
   0x4   :  { %429 = vset.pattern.permute.xlu2 %v454_v0  ;;  %v439_v10 = vld [vmem:[%s626_s2] ss:$0 sm:$0xff]  ;;  %s458_s2 = smov 120   ;;  %vm379_vm5 = vcmask 26624   ;;  %vm394_vm6 = vcmask 27649  }
   0x5   :  { %96 = vperm.xlu2 %429, %v74_v5   ;;  %v155_v50 = vld [vmem:[%s627_s6] sm:$0xff] }
   0xa   :  { %428 = vset.pattern.permute.xlu1 %v455_v7 }
   0xb   :  { %130 = vperm.xlu1 %428, %v75_v1   ;;  %402 = vmatmul.msk.f32.gmra.mxu0 %vm34_vm1, %v27_v6 }
   0xc   :  { %426 = vset.pattern.permute.xlu0 %v455_v7 }
   0xd   :  { %134 = vperm.xlu0 %426, %v76_v4   ;;  %430 = vset.pattern.permute.xlu2 %v455_v7 }
   0xe   :  { %126 = vperm.xlu2 %430, %v74_v5  }
  0x13   :  { %431 = vset.pattern.permute.xlu1 %v456_v9  ;;  %403 = vmatmul.msk.f32.gmra.mxu0 %vm34_vm1, %v28_v8 }
  0x14   :  { %89 = vperm.xlu1 %431, %v76_v4  }
  0x15   :  { %432 = vset.pattern.permute.xlu0 %v456_v9 }
  0x16   :  { %84 = vperm.xlu0 %432, %v75_v1  }
  0x1c   :  { %79 = vperm.xlu1 %431, %v74_v5  }
  0x1e   :  { %438 = vset.pattern.permute.xlu0 %v455_v7 }
  0x5f   :  { %v529_v13 = vpop.permute.xlu2 %96 }
  0x68   :  { %v545_v25 = vpop.permute.xlu2 %126 }
  0x74   :  { %v535_v18 = vpop.permute.xlu1 %100 }
  0x75   :  { %v533_v15 = vpop.permute.xlu0 %104 }
  0x7d   :  { %v547_v26 = vpop.permute.xlu1 %130 }
  0x7f   :  { %v539_v22 = vpop.permute.xlu0 %134 }
  0x80   :  { %v65_v11 = vpop.f32.mrf.mxu0 }
  0x81   :  { %v66_v12 = vadd.f32 %v439_v10, %v65_v11 }
  0x83   :  { %v107_v14 = vmul.f32 %v529_v13, %v66_v12  ;;  %v137_v27 = vmul.f32 %v545_v25, %v66_v12 }
  0x85   :  { %113 = vrot.lane.b32.xlu0 %v107_v14, %s457_s0 }
  0x86   :  { %v556_v33 = vpop.permute.xlu1 %89 }
  0x88   :  { %v68_v16 = vpop.f32.mrf.mxu0  ;;  %v553_v31 = vpop.permute.xlu0 %84 }
  0x89   :  { %v69_v17 = vadd.f32 %v439_v10, %v68_v16 }
  0x8b   :  { %v108_v19 = vmul.f32 %v535_v18, %v69_v17  ;;  %v138_v28 = vmul.f32 %v547_v26, %v69_v17  ;;  %v93_v32 = vmul.f32 %v553_v31, %v69_v17 }
  0x8d   :  { %115 = vrot.lane.b32.xlu2 %v108_v19, %s457_s0 }
  0x8e   :  { %v558_v37 = vpop.permute.xlu1 %79 }
  0x8f   :  { %v92_v43 = vmul.f32 %v558_v37, %v66_v12 }
  0x90   :  { %v71_v20 = vpop.f32.mrf.mxu0 }
  0x91   :  { %v72_v21 = vadd.f32 %v439_v10, %v71_v20 }
  0x93   :  { %v139_v23 = vmul.f32 %v539_v22, %v72_v21  ;;  %v109_v24 = vmul.f32 %v533_v15, %v72_v21  ;;  %v94_v38 = vmul.f32 %v556_v33, %v72_v21 }
  0x95   :  { %147 = vrot.lane.b32.xlu1 %v139_v23, %s458_s2  ;;  %117 = vrot.lane.b32.xlu2 %v109_v24, %s457_s0 }
  0x9d   :  { %145 = vrot.lane.b32.xlu2 %v138_v28, %s458_s2  ;;  %143 = vrot.lane.b32.xlu1 %v137_v27, %s458_s2 }
  0xe7   :  { %v116_v29 = vpop.permute.xlu2 %115 }
  0xe8   :  { %v123_v34 = vadd.f32 %v116_v29, %v93_v32 }
  0xef   :  { %v118_v30 = vpop.permute.xlu2 %117 }
  0xf0   :  { %v124_v39 = vadd.f32 %v118_v30, %v94_v38 }
  0xf7   :  { %v146_v35 = vpop.permute.xlu2 %145  ;;  %v114_v42 = vpop.permute.xlu0 %113 }
  0xf8   :  { %v153_v36 = vadd.f32 %v146_v35, %v123_v34  ;;  %v122_v44 = vadd.f32 %v114_v42, %v92_v43  ;;  %v286_v35 = vld [vmem:[%s628_s3] sm:$0xf] }
  0xf9   :  { %414 = vmatpush.msk.msra.mxu3 %vm44_vm0, %v286_v35 }
  0xfa   :  { %163 = vrot.lane.b32.xlu0 %v153_v36, %s459_s15 }
 0x107   :  { %v148_v40 = vpop.permute.xlu1 %147 }
 0x108   :  { %v154_v41 = vadd.f32 %v148_v40, %v124_v39 }
 0x10a   :  { %165 = vrot.lane.b32.xlu2 %v154_v41, %s459_s15 }
 0x10f   :  { %v144_v45 = vpop.permute.xlu1 %143 }
 0x110   :  { %v152_v46 = vadd.f32 %v144_v45, %v122_v44 }
 0x112   :  { %161 = vrot.lane.b32.xlu1 %v152_v46, %s459_s15  ;;  %v433_v62 = vpack.i.bf16 %v152_v46, %v153_v36 }
 0x164   :  { %v166_v47 = vpop.permute.xlu2 %165 }
 0x165   :  { %404 = vmatpush.xpose.msk.msra.mxu1 %vm34_vm1, %v166_v47 }
 0x16c   :  { %v164_v48 = vpop.permute.xlu0 %163 }
 0x16d   :  { %405 = vmatpush.xpose.msk.msra.mxu1 %vm34_vm1, %v164_v48 }
 0x184   :  { %v162_v49 = vpop.permute.xlu1 %161 }
 0x185   :  { %406 = vmatpush.xpose.msk.msra.mxu1 %vm34_vm1, %v162_v49 }
 0x188   :  { %407 = vmatmul.msk.f32.vlgmr.msra.gmra.mxu1 %vm34_vm1, %v152_v46 }
 0x190   :  { %408 = vmatmul.msk.f32.gmra.mxu1 %vm34_vm1, %v153_v36 }
 0x198   :  { %409 = vmatmul.msk.f32.gmra.mxu1 %vm34_vm1, %v154_v41 }
 0x205   :  { %v196_v51 = vpop.f32.mrf.mxu1 }
 0x206   :  { %v197_v52 = vadd.f32 %v196_v51, %v155_v50 }
 0x208   :  { %v206_v53 = vsel %vm205_vm2, %v197_v52, -inf }
 0x209   :  { %207 = vmax.xlane.f32.xlu2 %v206_v53 }
 0x20d   :  { %v199_v55 = vpop.f32.mrf.mxu1 }
 0x20e   :  { %v200_v56 = vadd.f32 %v199_v55, %v156_v54 }
 0x210   :  { %v209_v57 = vsel %vm205_vm2, %v200_v56, -inf }
 0x211   :  { %210 = vmax.xlane.f32.xlu0 %v209_v57 }
 0x215   :  { %v202_v59 = vpop.f32.mrf.mxu1 }
 0x216   :  { %v203_v60 = vadd.f32 %v202_v59, %v157_v58  ;;  %v440_v59 = vld [vmem:[%s629_s4] ss:$0 sm:$0xff] }
 0x218   :  { %v213_v61 = vsel %vm212_vm3, %v203_v60, -inf }
 0x219   :  { %214 = vmax.xlane.f32.xlu1 %v213_v61 }
 0x225   :  { %434 = vrot.lane.b32.xlu0 %v433_v62, %s460_s22 }
 0x27c   :  { %v208_v63 = vpop.xlane.xlu2 %207 }
 0x27d   :  { %v216_v0 = vsub.f32 %v197_v52, %v208_v63 }
 0x27f   :  { %v219_v1 = vmul.f32 1.442695, %v216_v0 }
 0x281   :  { %442 = vpow2.f32 %v219_v1 }
 0x284   :  { %v211_v2 = vpop.xlane.xlu0 %210 }
 0x285   :  { %v217_v3 = vsub.f32 %v200_v56, %v211_v2 }
 0x287   :  { %v443_v4 = vpop.eup %442  ;;  %v221_v5 = vmul.f32 1.442695, %v217_v3 }
 0x288   :  { %v225_v6 = vsel %vm205_vm2, %v443_v4, 0.0 }
 0x289   :  { %444 = vpow2.f32 %v221_v5  ;;  %226 = vadd.xlane.f32.xlu2 %v225_v6 }
 0x28c   :  { %v215_v7 = vpop.xlane.xlu1 %214 }
 0x28d   :  { %v218_v8 = vsub.f32 %v203_v60, %v215_v7 }
 0x28f   :  { %v445_v9 = vpop.eup %444  ;;  %v223_v10 = vmul.f32 1.442695, %v218_v8 }
 0x290   :  { %v228_v11 = vsel %vm205_vm2, %v445_v9, 0.0 }
 0x291   :  { %446 = vpow2.f32 %v223_v10  ;;  %229 = vadd.xlane.f32.xlu1 %v228_v11 }
 0x297   :  { %v447_v12 = vpop.eup %446  ;;  %v435_v17 = vpop.permute.xlu0 %434 }
 0x298   :  { %v231_v14 = vsel %vm212_vm3, %v447_v12, 0.0  ;;  %v436_v23 = vunpack.i.l.bf16 %v435_v17  ;;  %v437_v24 = vunpack.i.h.bf16 %v435_v17 }
 0x299   :  { %232 = vadd.xlane.f32.xlu1 %v231_v14 }
 0x2a1   :  { %244 = vrot.lane.b32.xlu2 %v154_v41, %s460_s22 }
 0x2fc   :  { %v227_v16 = vpop.xlane.xlu2 %226 }
 0x2fd   :  { %448 = vrcp.f32 %v227_v16 }
 0x303   :  { %v449_v21 = vpop.eup %448 }
 0x304   :  { %v230_v19 = vpop.xlane.xlu1 %229  ;;  %v245_v20 = vpop.permute.xlu2 %244  ;;  %v237_v27 = vmul.f32 %v449_v21, %v443_v4 }
 0x305   :  { %410 = vmatpush.msk.msra.mxu2 %vm257_vm4, %v245_v20  ;;  %450 = vrcp.f32 %v230_v19 }
 0x307   :  { %274 = vmatpush.msra.mxu2 %v436_v23 }
 0x309   :  { %275 = vmatpush.msra.mxu2 %v437_v24 }
 0x30a   :  { %411 = vmatmul.msk.f32.vlgmr.msra.gmra.mxu2 %vm205_vm2, %v237_v27 }
 0x30b   :  { %v451_v29 = vpop.eup %450 }
 0x30c   :  { %v233_v28 = vpop.xlane.xlu1 %232  ;;  %v238_v30 = vmul.f32 %v451_v29, %v445_v9 }
 0x30d   :  { %452 = vrcp.f32 %v233_v28 }
 0x312   :  { %412 = vmatmul.msk.f32.gmra.mxu2 %vm205_vm2, %v238_v30 }
 0x313   :  { %v453_v32 = vpop.eup %452 }
 0x314   :  { %v239_v34 = vmul.f32 %v453_v32, %v447_v12 }
 0x31a   :  { %413 = vmatmul.msk.f32.gmra.mxu2 %vm205_vm2, %v239_v34 }
 0x38d   :  { %v277_v36 = vpop.f32.mrf.mxu2 }
 0x38e   :  { %415 = vmatmul.msk.f32.vlgmr.msra.gmra.mxu3 %vm34_vm1, %v277_v36 }
 0x395   :  { %v280_v38 = vpop.f32.mrf.mxu2 }
 0x396   :  { %416 = vmatmul.msk.f32.gmra.mxu3 %vm34_vm1, %v280_v38 }
 0x39d   :  { %v283_v39 = vpop.f32.mrf.mxu2 }
 0x39e   :  { %417 = vmatmul.msk.f32.gmra.mxu3 %vm34_vm1, %v283_v39 }
 0x411   :  { %v316_v40 = vpop.f32.mrf.mxu3 }
 0x412   :  { %v328_v41 = vmul.f32 %v316_v40, %v529_v13  ;;  %v346_v42 = vmul.f32 %v316_v40, %v545_v25 }
 0x414   :  { %352 = vrot.lane.b32.xlu0 %v346_v42, %s458_s2  ;;  %334 = vrot.lane.b32.xlu1 %v328_v41, %s457_s0 }
 0x419   :  { %v319_v43 = vpop.f32.mrf.mxu3 }
 0x41a   :  { %v329_v44 = vmul.f32 %v319_v43, %v535_v18  ;;  %v347_v13 = vmul.f32 %v319_v43, %v547_v26  ;;  %v325_v18 = vmul.f32 %v316_v40, %v558_v37  ;;  %v326_v52 = vmul.f32 %v319_v43, %v553_v31 }
 0x41c   :  { %336 = vrot.lane.b32.xlu0 %v329_v44, %s457_s0 }
 0x421   :  { %v322_v45 = vpop.f32.mrf.mxu3 }
 0x422   :  { %v330_v46 = vmul.f32 %v322_v45, %v533_v15  ;;  %v348_v47 = vmul.f32 %v322_v45, %v539_v22  ;;  %v327_v56 = vmul.f32 %v322_v45, %v556_v33  ;;  %v441_v33 = vld [vmem:[%s629_s4] ss:$0 sm:$0xff] }
 0x424   :  { %356 = vrot.lane.b32.xlu0 %v348_v47, %s458_s2  ;;  %338 = vrot.lane.b32.xlu2 %v330_v46, %s457_s0 }
 0x42c   :  { %354 = vrot.lane.b32.xlu2 %v347_v13, %s458_s2 }
 0x47e   :  { %v339_v25 = vpop.permute.xlu2 %338 }
 0x47f   :  { %v345_v60 = vadd.f32 %v339_v25, %v327_v56 }
 0x486   :  { %v353_v48 = vpop.permute.xlu0 %352  ;;  %v335_v49 = vpop.permute.xlu1 %334 }
 0x487   :  { %v343_v50 = vadd.f32 %v335_v49, %v325_v18  ;;  %v355_v54 = vpop.permute.xlu2 %354 }
 0x489   :  { %v361_v51 = vadd.f32 %v353_v48, %v343_v50 }
 0x48b   :  { %v365_v22 = vrot.slane %v361_v51, 3  ;;  %v369_v57 = vrot.slane %v361_v51, 6 }
 0x48d   :  { %v367_v58 = vadd.f32 %v365_v22, %v361_v51 }
 0x48e   :  { %v337_v15 = vpop.permute.xlu0 %336 }
 0x48f   :  { %v344_v53 = vadd.f32 %v337_v15, %v326_v52 }
 0x491   :  { %v362_v55 = vadd.f32 %v355_v54, %v344_v53 }
 0x493   :  { %v370_v26 = vrot.slane %v362_v55, 6  ;;  %v381_v62 = vrot.slane %v362_v55, 3 }
 0x495   :  { %v371_v37 = vsel %vm257_vm4, %v369_v57, %v370_v26  ;;  %v383_v2 = vadd.f32 %v381_v62, %v362_v55 }
 0x496   :  { %v373_v61 = vadd.f32 %v371_v37, %v367_v58  ;;  %v357_v31 = vpop.permute.xlu0 %356 }
 0x497   :  { %v363_v63 = vadd.f32 %v357_v31, %v345_v60 }
 0x498   :  { %v378_v0 = vadd.f32 %v440_v59, %v373_v61 }
 0x499   :  { %v385_v1 = vrot.slane %v363_v63, 6 }
 0x49a   :  { %380 = vst.msk [vmem:[%s630_s7] sm:$0x7] %vm379_vm5, %v378_v0 }
 0x49b   :  { %v386_v3 = vsel %vm257_vm4, %v370_v26, %v385_v1 }
 0x49c   :  { %v388_v4 = vadd.f32 %v386_v3, %v383_v2 }
 0x49e   :  { %v393_v5 = vadd.f32 %v441_v33, %v388_v4 }
 0x4a0   :  { %395 = vst.msk [vmem:[%s630_s7 + $0x2] sm:$0xe] %vm394_vm6, %v393_v5 }

</bundles_post_ra>
